<compile_context>
chip_gen: v7x
topology: tpu7x:2x2x1
jax: 0.10.0
libtpu: 0.0.40
codegen_flags: <defaults>
</compile_context>

<pallas_src>
import math
import functools

import jax
import jax.numpy as jnp
import numpy as np
from jax.experimental import pallas as pl
from jax.experimental.pallas import tpu as pltpu

EPS = 1e-6


def _encoder_layer_kernel(H, dk, block_batch,
                          x_ref, mask_ref,
                          ln1_a_ref, ln1_b_ref,
                          wqkv_ref, bqkv_ref, wo_ref, bo_ref,
                          ln2_a_ref, ln2_b_ref,
                          w1_ref, b1_ref, w2_ref, b2_ref,
                          o_ref, *, matmul_dtype):
    D = x_ref.shape[-1]
    scale = 1.0 / math.sqrt(dk)

    # Load weights once per grid step (hoisted out of the batch-element loop)
    # and cast the matmul operands to bf16; accumulation stays f32 on the MXU.
    ln1_a = ln1_a_ref[...]
    ln1_b = ln1_b_ref[...]
    ln2_a = ln2_a_ref[...]
    ln2_b = ln2_b_ref[...]
    wqkv = wqkv_ref[...].astype(matmul_dtype)    # (H, D, 3*dk) fused Q|K|V
    bqkv = bqkv_ref[...]                         # (H, 1, 3*dk) f32
    wo = wo_ref[...].astype(matmul_dtype)        # (H, dk, D)
    bo = bo_ref[...]                             # (1, D)
    w1 = w1_ref[...].astype(matmul_dtype)        # (D, DFF)
    b1 = b1_ref[...]                             # (1, DFF)
    w2 = w2_ref[...].astype(matmul_dtype)        # (DFF, D)
    b2 = b2_ref[...]                             # (1, D)

    def layer_norm(v, a, b):
        # Matches the manual PyTorch LayerNorm: unbiased (D-1) std, eps on std.
        mean = jnp.mean(v, axis=-1, keepdims=True)
        var = jnp.sum((v - mean) ** 2, axis=-1, keepdims=True) / (D - 1)
        return a * (v - mean) / (jnp.sqrt(var) + EPS) + b

    for b in range(block_batch):                 # static, small unroll
        x = x_ref[b]                             # (S, D) f32
        masked = mask_ref[b] == 0.0              # (1, S) — hoisted, once per elem

        # ---- Sublayer 0: multi-head self-attention on LayerNorm(x) ----
        y = layer_norm(x, ln1_a, ln1_b)          # (S, D) f32
        # Single fused-QKV batched matmul over heads: no per-head lane slicing
        # of activations, no lane-axis concatenate, no in-kernel head reshape.
        y_h = jnp.broadcast_to(y.astype(matmul_dtype), (H,) + y.shape)   # (H,S,D)
        qkv = jnp.einsum('hse,hef->hsf', y_h, wqkv,
                         preferred_element_type=jnp.float32) + bqkv      # (H,S,3dk)
        q = qkv[..., 0 * dk:1 * dk].astype(matmul_dtype)                 # (H,S,dk)
        k = qkv[..., 1 * dk:2 * dk].astype(matmul_dtype)
        v = qkv[..., 2 * dk:3 * dk].astype(matmul_dtype)

        s = jnp.einsum('hqd,hkd->hqk', q, k,
                       preferred_element_type=jnp.float32) * scale       # (H,S,S)
        s = jnp.where(masked, jnp.float32(-1e9), s)   # masked_fill over keys
        s = s - jnp.max(s, axis=-1, keepdims=True)
        p = jnp.exp(s)
        p = p * pl.reciprocal(jnp.sum(p, axis=-1, keepdims=True), approx=True)

        ctx = jnp.einsum('hqk,hkd->hqd', p.astype(matmul_dtype), v,
                         preferred_element_type=jnp.float32)             # (H,S,dk)
        # Output projection with per-head weight slabs; heads summed after.
        attn = jnp.einsum('hqd,hde->hqe', ctx.astype(matmul_dtype), wo,
                          preferred_element_type=jnp.float32)            # (H,S,D)
        attn_out = jnp.sum(attn, axis=0) + bo                            # (S, D)
        x1 = x + attn_out                        # residual (dropout = identity)

        # ---- Sublayer 1: position-wise feed-forward on LayerNorm(x1) ----
        y2 = layer_norm(x1, ln2_a, ln2_b)
        h1 = jnp.dot(y2.astype(matmul_dtype), w1,
                     preferred_element_type=jnp.float32) + b1
        h1 = jnp.maximum(h1, 0.0)
        ffn = jnp.dot(h1.astype(matmul_dtype), w2,
                      preferred_element_type=jnp.float32) + b2

        o_ref[b] = x1 + ffn


def encoder_layer(x, mask, params, *, num_heads, block_batch=1,
                  matmul_dtype=jnp.bfloat16):
    B, S, D = x.shape
    assert D % num_heads == 0 and B % block_batch == 0
    H, dk = num_heads, D // num_heads
    f32 = jnp.float32

    # ---- Host-side one-time weight packing (layout plumbing, not compute) ----
    def per_head_w(w):   # (D, D) -> (H, D, dk):  w_h[h, e, j] = w[e, h*dk + j]
        return w.reshape(D, H, dk).transpose(1, 0, 2)

    def per_head_b(b):   # (1, D) -> (H, 1, dk)
        return b.reshape(H, dk)[:, None, :]

    wqkv = jnp.concatenate([per_head_w(params["wq"]),
                            per_head_w(params["wk"]),
                            per_head_w(params["wv"])], axis=-1)    # (H, D, 3*dk)
    bqkv = jnp.concatenate([per_head_b(params["bq"]),
                            per_head_b(params["bk"]),
                            per_head_b(params["bv"])], axis=-1)    # (H, 1, 3*dk)
    wo_h = params["wo"].reshape(H, dk, D)                          # (H, dk, D)

    param_list = [
        params["ln1_a"].astype(f32), params["ln1_b"].astype(f32),
        wqkv.astype(f32), bqkv.astype(f32),
        wo_h.astype(f32), params["bo"].astype(f32),
        params["ln2_a"].astype(f32), params["ln2_b"].astype(f32),
        params["w1"].astype(f32), params["b1"].astype(f32),
        params["w2"].astype(f32), params["b2"].astype(f32),
    ]

    in_specs = [
        pl.BlockSpec((block_batch, S, D), lambda b: (b, 0, 0)),
        pl.BlockSpec((block_batch, 1, S), lambda b: (b, 0, 0)),
    ] + [
        # Whole-array weight blocks, constant index_map (same block every step).
        # At real D / d_ff, add pipeline_mode=pl.Buffered(1) to avoid
        # double-buffering weights that never change across grid steps.
        pl.BlockSpec(p.shape, functools.partial(lambda n, b: (0,) * n, p.ndim))
        for p in param_list
    ]

    kernel = functools.partial(_encoder_layer_kernel, H, dk, block_batch,
                               matmul_dtype=matmul_dtype)

    return pl.pallas_call(
        kernel,
        out_shape=jax.ShapeDtypeStruct((B, S, D), f32),
        grid=(B // block_batch,),
        in_specs=in_specs,
        out_specs=pl.BlockSpec((block_batch, S, D), lambda b: (b, 0, 0)),
        compiler_params=pltpu.CompilerParams(
            dimension_semantics=("parallel",)),
    )(x.astype(f32), mask.astype(f32), *param_list)


def reference_encoder_layer(x, mask, params, *, num_heads):
    """Pure-JAX reference mirroring the PyTorch semantics (eval mode)."""
    B, S, D = x.shape
    dk = D // num_heads

    def ln(v, a, b):
        mean = v.mean(-1, keepdims=True)
        var = ((v - mean) ** 2).sum(-1, keepdims=True) / (D - 1)
        return a * (v - mean) / (jnp.sqrt(var) + EPS) + b

    y = ln(x, params["ln1_a"], params["ln1_b"])
    q = y @ params["wq"] + params["bq"]
    k = y @ params["wk"] + params["bk"]
    v = y @ params["wv"] + params["bv"]

    def split(t):  # (B,S,D) -> (B,H,S,dk)
        return t.reshape(B, S, num_heads, dk).transpose(0, 2, 1, 3)

    qh, kh, vh = split(q), split(k), split(v)
    scores = jnp.einsum("bhqd,bhkd->bhqk", qh, kh) / math.sqrt(dk)
    scores = jnp.where(mask[:, :, None, :] == 0, -1e9, scores)
    p = jax.nn.softmax(scores, axis=-1)
    ctx = jnp.einsum("bhqk,bhkd->bhqd", p, vh).transpose(0, 2, 1, 3).reshape(B, S, D)
    x1 = x + (ctx @ params["wo"] + params["bo"])

    y2 = ln(x1, params["ln2_a"], params["ln2_b"])
    ffn = jnp.maximum(y2 @ params["w1"] + params["b1"], 0.0) @ params["w2"] + params["b2"]
    return x1 + ffn


if __name__ == "__main__":
    B, S, D, H, DFF = 2, 8, 32, 4, 64

    key = jax.random.PRNGKey(0)
    keys = jax.random.split(key, 12)

    def init(k, shape, scale=0.1):
        return (scale * jax.random.normal(k, shape)).astype(jnp.float32)

    params = {
        "ln1_a": jnp.ones((1, D), jnp.float32),
        "ln1_b": jnp.zeros((1, D), jnp.float32),
        "wq": init(keys[0], (D, D)), "bq": init(keys[1], (1, D)),
        "wk": init(keys[2], (D, D)), "bk": init(keys[3], (1, D)),
        "wv": init(keys[4], (D, D)), "bv": init(keys[5], (1, D)),
        "wo": init(keys[6], (D, D)), "bo": init(keys[7], (1, D)),
        "ln2_a": jnp.ones((1, D), jnp.float32),
        "ln2_b": jnp.zeros((1, D), jnp.float32),
        "w1": init(keys[8], (D, DFF)), "b1": init(keys[9], (1, DFF)),
        "w2": init(keys[10], (DFF, D)), "b2": init(keys[11], (1, D)),
    }

    x = jax.random.normal(jax.random.PRNGKey(1), (B, S, D), jnp.float32)
    # mask: (B, 1, S); second batch element has two padded (masked) key positions
    mask = jnp.ones((B, 1, S), jnp.float32)
    mask = mask.at[1, 0, -2:].set(0.0)

    ref = reference_encoder_layer(x, mask, params, num_heads=H)

    # Default (performance) path: bf16 matmul operands, f32 accumulation.
    out_bf16 = jax.block_until_ready(encoder_layer(x, mask, params, num_heads=H))
    np.testing.assert_allclose(np.asarray(out_bf16), np.asarray(ref),
                               rtol=3e-2, atol=3e-2)

    # f32-matmul path (tighter check of the kernel's logic; approx reciprocal
    # in the softmax keeps this from being bit-exact).
    out_f32 = jax.block_until_ready(
        encoder_layer(x, mask, params, num_heads=H, matmul_dtype=jnp.float32))
    np.testing.assert_allclose(np.asarray(out_f32), np.asarray(ref),
                               rtol=1e-2, atol=1e-2)

    # Multiple batch elements per grid step (bigger block per step).
    out_bt2 = jax.block_until_ready(
        encoder_layer(x, mask, params, num_heads=H, block_batch=2))
    np.testing.assert_allclose(np.asarray(out_bt2), np.asarray(ref),
                               rtol=3e-2, atol=3e-2)

    print("KERNEL_OK")
</pallas_src>

<mosaic_0001>
module attributes {stable_mosaic.version = 11 : i64} {
  func.func @_encoder_layer_kernel(%arg0: i32, %arg1: memref<1x8x32xf32, #tpu.memory_space<vmem>>, %arg2: memref<1x1x8xf32, #tpu.memory_space<vmem>>, %arg3: memref<1x32xf32, #tpu.memory_space<vmem>>, %arg4: memref<1x32xf32, #tpu.memory_space<vmem>>, %arg5: memref<4x32x24xf32, #tpu.memory_space<vmem>>, %arg6: memref<4x1x24xf32, #tpu.memory_space<vmem>>, %arg7: memref<4x8x32xf32, #tpu.memory_space<vmem>>, %arg8: memref<1x32xf32, #tpu.memory_space<vmem>>, %arg9: memref<1x32xf32, #tpu.memory_space<vmem>>, %arg10: memref<1x32xf32, #tpu.memory_space<vmem>>, %arg11: memref<32x64xf32, #tpu.memory_space<vmem>>, %arg12: memref<1x64xf32, #tpu.memory_space<vmem>>, %arg13: memref<64x32xf32, #tpu.memory_space<vmem>>, %arg14: memref<1x32xf32, #tpu.memory_space<vmem>>, %arg15: memref<1x8x32xf32, #tpu.memory_space<vmem>>) attributes {dimension_semantics = [#tpu.dimension_semantics<parallel>], iteration_bounds = array<i64: 2>, scalar_prefetch = 0 : i64, scratch_operands = 0 : i64, tpu.core_type = #tpu.core_type<tc>, window_params = [{transform_indices = @transform_0, window_bounds = array<i64: 1, 8, 32>}, {transform_indices = @transform_1, window_bounds = array<i64: 1, 1, 8>}, {pipeline_mode = #tpu.pipeline_mode<synchronous>, transform_indices = @transform_2, window_bounds = array<i64: 1, 32>}, {pipeline_mode = #tpu.pipeline_mode<synchronous>, transform_indices = @transform_3, window_bounds = array<i64: 1, 32>}, {pipeline_mode = #tpu.pipeline_mode<synchronous>, transform_indices = @transform_4, window_bounds = array<i64: 4, 32, 24>}, {pipeline_mode = #tpu.pipeline_mode<synchronous>, transform_indices = @transform_5, window_bounds = array<i64: 4, 1, 24>}, {pipeline_mode = #tpu.pipeline_mode<synchronous>, transform_indices = @transform_6, window_bounds = array<i64: 4, 8, 32>}, {pipeline_mode = #tpu.pipeline_mode<synchronous>, transform_indices = @transform_7, window_bounds = array<i64: 1, 32>}, {pipeline_mode = #tpu.pipeline_mode<synchronous>, transform_indices = @transform_8, window_bounds = array<i64: 1, 32>}, {pipeline_mode = #tpu.pipeline_mode<synchronous>, transform_indices = @transform_9, window_bounds = array<i64: 1, 32>}, {pipeline_mode = #tpu.pipeline_mode<synchronous>, transform_indices = @transform_10, window_bounds = array<i64: 32, 64>}, {pipeline_mode = #tpu.pipeline_mode<synchronous>, transform_indices = @transform_11, window_bounds = array<i64: 1, 64>}, {pipeline_mode = #tpu.pipeline_mode<synchronous>, transform_indices = @transform_12, window_bounds = array<i64: 64, 32>}, {pipeline_mode = #tpu.pipeline_mode<synchronous>, transform_indices = @transform_13, window_bounds = array<i64: 1, 32>}, {transform_indices = @transform_14, window_bounds = array<i64: 1, 8, 32>}]} {
    %c0 = arith.constant 0 : index
    %c0_0 = arith.constant 0 : index
    %0 = vector.load %arg3[%c0, %c0_0] : memref<1x32xf32, #tpu.memory_space<vmem>>, vector<1x32xf32>
    %c0_1 = arith.constant 0 : index
    %c0_2 = arith.constant 0 : index
    %1 = vector.load %arg4[%c0_1, %c0_2] : memref<1x32xf32, #tpu.memory_space<vmem>>, vector<1x32xf32>
    %c0_3 = arith.constant 0 : index
    %c0_4 = arith.constant 0 : index
    %2 = vector.load %arg9[%c0_3, %c0_4] : memref<1x32xf32, #tpu.memory_space<vmem>>, vector<1x32xf32>
    %c0_5 = arith.constant 0 : index
    %c0_6 = arith.constant 0 : index
    %3 = vector.load %arg10[%c0_5, %c0_6] : memref<1x32xf32, #tpu.memory_space<vmem>>, vector<1x32xf32>
    %c0_7 = arith.constant 0 : index
    %c0_8 = arith.constant 0 : index
    %c0_9 = arith.constant 0 : index
    %4 = vector.load %arg5[%c0_7, %c0_8, %c0_9] : memref<4x32x24xf32, #tpu.memory_space<vmem>>, vector<4x32x24xf32>
    %5 = arith.truncf %4 : vector<4x32x24xf32> to vector<4x32x24xbf16>
    %c0_10 = arith.constant 0 : index
    %c0_11 = arith.constant 0 : index
    %c0_12 = arith.constant 0 : index
    %6 = vector.load %arg6[%c0_10, %c0_11, %c0_12] : memref<4x1x24xf32, #tpu.memory_space<vmem>>, vector<4x1x24xf32>
    %c0_13 = arith.constant 0 : index
    %c0_14 = arith.constant 0 : index
    %c0_15 = arith.constant 0 : index
    %7 = vector.load %arg7[%c0_13, %c0_14, %c0_15] : memref<4x8x32xf32, #tpu.memory_space<vmem>>, vector<4x8x32xf32>
    %8 = arith.truncf %7 : vector<4x8x32xf32> to vector<4x8x32xbf16>
    %c0_16 = arith.constant 0 : index
    %c0_17 = arith.constant 0 : index
    %9 = vector.load %arg8[%c0_16, %c0_17] : memref<1x32xf32, #tpu.memory_space<vmem>>, vector<1x32xf32>
    %c0_18 = arith.constant 0 : index
    %c0_19 = arith.constant 0 : index
    %10 = vector.load %arg11[%c0_18, %c0_19] : memref<32x64xf32, #tpu.memory_space<vmem>>, vector<32x64xf32>
    %11 = arith.truncf %10 : vector<32x64xf32> to vector<32x64xbf16>
    %c0_20 = arith.constant 0 : index
    %c0_21 = arith.constant 0 : index
    %12 = vector.load %arg12[%c0_20, %c0_21] : memref<1x64xf32, #tpu.memory_space<vmem>>, vector<1x64xf32>
    %c0_22 = arith.constant 0 : index
    %c0_23 = arith.constant 0 : index
    %13 = vector.load %arg13[%c0_22, %c0_23] : memref<64x32xf32, #tpu.memory_space<vmem>>, vector<64x32xf32>
    %14 = arith.truncf %13 : vector<64x32xf32> to vector<64x32xbf16>
    %c0_24 = arith.constant 0 : index
    %c0_25 = arith.constant 0 : index
    %15 = vector.load %arg14[%c0_24, %c0_25] : memref<1x32xf32, #tpu.memory_space<vmem>>, vector<1x32xf32>
    %c0_26 = arith.constant 0 : index
    %c0_27 = arith.constant 0 : index
    %c0_28 = arith.constant 0 : index
    %16 = vector.load %arg1[%c0_26, %c0_27, %c0_28] : memref<1x8x32xf32, #tpu.memory_space<vmem>>, vector<1x8x32xf32>
    %17 = vector.shape_cast %16 : vector<1x8x32xf32> to vector<8x32xf32>
    %c0_29 = arith.constant 0 : index
    %c0_30 = arith.constant 0 : index
    %c0_31 = arith.constant 0 : index
    %18 = vector.load %arg2[%c0_29, %c0_30, %c0_31] : memref<1x1x8xf32, #tpu.memory_space<vmem>>, vector<1x1x8xf32>
    %19 = vector.shape_cast %18 : vector<1x1x8xf32> to vector<1x8xf32>
    %cst = arith.constant 0.000000e+00 : f32
    %20 = vector.broadcast %cst : f32 to vector<1x8xf32>
    %21 = arith.cmpf oeq, %19, %20 : vector<1x8xf32>
    %cst_32 = arith.constant dense<0.000000e+00> : vector<8xf32>
    %22 = vector.multi_reduction <add>, %17, %cst_32 [1] : vector<8x32xf32> to vector<8xf32>
    %23 = vector.shape_cast %22 : vector<8xf32> to vector<8x1xf32>
    %cst_33 = arith.constant 3.200000e+01 : f32
    %24 = vector.broadcast %cst_33 : f32 to vector<8x1xf32>
    %25 = arith.divf %23, %24 : vector<8x1xf32>
    %26 = vector.broadcast %25 : vector<8x1xf32> to vector<8x32xf32>
    %27 = arith.subf %17, %26 : vector<8x32xf32>
    %28 = arith.mulf %27, %27 : vector<8x32xf32>
    %cst_34 = arith.constant dense<0.000000e+00> : vector<8xf32>
    %29 = vector.multi_reduction <add>, %28, %cst_34 [1] : vector<8x32xf32> to vector<8xf32>
    %30 = vector.shape_cast %29 : vector<8xf32> to vector<8x1xf32>
    %cst_35 = arith.constant 3.100000e+01 : f32
    %31 = vector.broadcast %cst_35 : f32 to vector<8x1xf32>
    %32 = arith.divf %30, %31 : vector<8x1xf32>
    %33 = vector.broadcast %25 : vector<8x1xf32> to vector<8x32xf32>
    %34 = arith.subf %17, %33 : vector<8x32xf32>
    %35 = vector.broadcast %0 : vector<1x32xf32> to vector<8x32xf32>
    %36 = arith.mulf %35, %34 : vector<8x32xf32>
    %37 = math.sqrt %32 : vector<8x1xf32>
    %cst_36 = arith.constant 9.99999997E-7 : f32
    %38 = vector.broadcast %cst_36 : f32 to vector<8x1xf32>
    %39 = arith.addf %37, %38 : vector<8x1xf32>
    %40 = vector.broadcast %39 : vector<8x1xf32> to vector<8x32xf32>
    %41 = arith.divf %36, %40 : vector<8x32xf32>
    %42 = vector.broadcast %1 : vector<1x32xf32> to vector<8x32xf32>
    %43 = arith.addf %41, %42 : vector<8x32xf32>
    %44 = arith.truncf %43 : vector<8x32xf32> to vector<8x32xbf16>
    %45 = vector.shape_cast %44 : vector<8x32xbf16> to vector<1x8x32xbf16>
    %46 = vector.broadcast %45 : vector<1x8x32xbf16> to vector<4x8x32xbf16>
    "tpu.trace_start"() <{level = 10 : i32, message = "hse,hef->hsf"}> : () -> ()
    %cst_37 = arith.constant dense<0.000000e+00> : vector<4x8x24xf32>
    %47 = tpu.matmul %46, %5, %cst_37 {dimension_numbers = #tpu.dot_dimension_numbers<[2], [1], [1], [2], [0, 0, 0, 1, 1, 2], [0], [0]>} : vector<4x8x32xbf16>, vector<4x32x24xbf16>, vector<4x8x24xf32> -> vector<4x8x24xf32>
    "tpu.trace_stop"() : () -> ()
    %48 = vector.broadcast %6 : vector<4x1x24xf32> to vector<4x8x24xf32>
    %49 = arith.addf %47, %48 : vector<4x8x24xf32>
    %50 = vector.extract_strided_slice %49 {offsets = [0, 0, 0], sizes = [4, 8, 8], strides = [1, 1, 1]} : vector<4x8x24xf32> to vector<4x8x8xf32>
    %51 = arith.truncf %50 : vector<4x8x8xf32> to vector<4x8x8xbf16>
    %52 = vector.extract_strided_slice %49 {offsets = [0, 0, 8], sizes = [4, 8, 8], strides = [1, 1, 1]} : vector<4x8x24xf32> to vector<4x8x8xf32>
    %53 = arith.truncf %52 : vector<4x8x8xf32> to vector<4x8x8xbf16>
    %54 = vector.extract_strided_slice %49 {offsets = [0, 0, 16], sizes = [4, 8, 8], strides = [1, 1, 1]} : vector<4x8x24xf32> to vector<4x8x8xf32>
    %55 = arith.truncf %54 : vector<4x8x8xf32> to vector<4x8x8xbf16>
    "tpu.trace_start"() <{level = 10 : i32, message = "hqd,hkd->hqk"}> : () -> ()
    %cst_38 = arith.constant dense<0.000000e+00> : vector<4x8x8xf32>
    %56 = tpu.matmul %51, %53, %cst_38 {dimension_numbers = #tpu.dot_dimension_numbers<[2], [2], [1], [1], [0, 0, 0, 1, 1, 1], [0], [0]>} : vector<4x8x8xbf16>, vector<4x8x8xbf16>, vector<4x8x8xf32> -> vector<4x8x8xf32>
    "tpu.trace_stop"() : () -> ()
    %cst_39 = arith.constant 0.353553385 : f32
    %57 = vector.broadcast %cst_39 : f32 to vector<4x8x8xf32>
    %58 = arith.mulf %56, %57 : vector<4x8x8xf32>
    %cst_40 = arith.constant -1.000000e+09 : f32
    %59 = vector.shape_cast %21 : vector<1x8xi1> to vector<1x1x8xi1>
    %60 = vector.broadcast %59 : vector<1x1x8xi1> to vector<4x8x8xi1>
    %61 = vector.broadcast %cst_40 : f32 to vector<4x8x8xf32>
    %62 = arith.select %60, %61, %58 : vector<4x8x8xi1>, vector<4x8x8xf32>
    %cst_41 = arith.constant dense<0xFF800000> : vector<4x8xf32>
    %63 = vector.multi_reduction <maximumf>, %62, %cst_41 [2] : vector<4x8x8xf32> to vector<4x8xf32>
    %64 = vector.shape_cast %63 : vector<4x8xf32> to vector<4x8x1xf32>
    %65 = vector.broadcast %64 : vector<4x8x1xf32> to vector<4x8x8xf32>
    %66 = arith.subf %62, %65 : vector<4x8x8xf32>
    %67 = math.exp %66 : vector<4x8x8xf32>
    %cst_42 = arith.constant dense<0.000000e+00> : vector<4x8xf32>
    %68 = vector.multi_reduction <add>, %67, %cst_42 [2] : vector<4x8x8xf32> to vector<4x8xf32>
    %69 = vector.shape_cast %68 : vector<4x8xf32> to vector<4x8x1xf32>
    %70 = tpu.reciprocal %69 {approx = true} : vector<4x8x1xf32> -> vector<4x8x1xf32>
    %71 = vector.broadcast %70 : vector<4x8x1xf32> to vector<4x8x8xf32>
    %72 = arith.mulf %67, %71 : vector<4x8x8xf32>
    %73 = arith.truncf %72 : vector<4x8x8xf32> to vector<4x8x8xbf16>
    "tpu.trace_start"() <{level = 10 : i32, message = "hqk,hkd->hqd"}> : () -> ()
    %cst_43 = arith.constant dense<0.000000e+00> : vector<4x8x8xf32>
    %74 = tpu.matmul %73, %55, %cst_43 {dimension_numbers = #tpu.dot_dimension_numbers<[2], [1], [1], [2], [0, 0, 0, 1, 1, 2], [0], [0]>} : vector<4x8x8xbf16>, vector<4x8x8xbf16>, vector<4x8x8xf32> -> vector<4x8x8xf32>
    "tpu.trace_stop"() : () -> ()
    %75 = arith.truncf %74 : vector<4x8x8xf32> to vector<4x8x8xbf16>
    "tpu.trace_start"() <{level = 10 : i32, message = "hqd,hde->hqe"}> : () -> ()
    %cst_44 = arith.constant dense<0.000000e+00> : vector<4x8x32xf32>
    %76 = tpu.matmul %75, %8, %cst_44 {dimension_numbers = #tpu.dot_dimension_numbers<[2], [1], [1], [2], [0, 0, 0, 1, 1, 2], [0], [0]>} : vector<4x8x8xbf16>, vector<4x8x32xbf16>, vector<4x8x32xf32> -> vector<4x8x32xf32>
    "tpu.trace_stop"() : () -> ()
    %cst_45 = arith.constant dense<0.000000e+00> : vector<8x32xf32>
    %77 = vector.multi_reduction <add>, %76, %cst_45 [0] : vector<4x8x32xf32> to vector<8x32xf32>
    %78 = vector.broadcast %9 : vector<1x32xf32> to vector<8x32xf32>
    %79 = arith.addf %77, %78 : vector<8x32xf32>
    %80 = arith.addf %17, %79 : vector<8x32xf32>
    %cst_46 = arith.constant dense<0.000000e+00> : vector<8xf32>
    %81 = vector.multi_reduction <add>, %80, %cst_46 [1] : vector<8x32xf32> to vector<8xf32>
    %82 = vector.shape_cast %81 : vector<8xf32> to vector<8x1xf32>
    %cst_47 = arith.constant 3.200000e+01 : f32
    %83 = vector.broadcast %cst_47 : f32 to vector<8x1xf32>
    %84 = arith.divf %82, %83 : vector<8x1xf32>
    %85 = vector.broadcast %84 : vector<8x1xf32> to vector<8x32xf32>
    %86 = arith.subf %80, %85 : vector<8x32xf32>
    %87 = arith.mulf %86, %86 : vector<8x32xf32>
    %cst_48 = arith.constant dense<0.000000e+00> : vector<8xf32>
    %88 = vector.multi_reduction <add>, %87, %cst_48 [1] : vector<8x32xf32> to vector<8xf32>
    %89 = vector.shape_cast %88 : vector<8xf32> to vector<8x1xf32>
    %cst_49 = arith.constant 3.100000e+01 : f32
    %90 = vector.broadcast %cst_49 : f32 to vector<8x1xf32>
    %91 = arith.divf %89, %90 : vector<8x1xf32>
    %92 = vector.broadcast %84 : vector<8x1xf32> to vector<8x32xf32>
    %93 = arith.subf %80, %92 : vector<8x32xf32>
    %94 = vector.broadcast %2 : vector<1x32xf32> to vector<8x32xf32>
    %95 = arith.mulf %94, %93 : vector<8x32xf32>
    %96 = math.sqrt %91 : vector<8x1xf32>
    %cst_50 = arith.constant 9.99999997E-7 : f32
    %97 = vector.broadcast %cst_50 : f32 to vector<8x1xf32>
    %98 = arith.addf %96, %97 : vector<8x1xf32>
    %99 = vector.broadcast %98 : vector<8x1xf32> to vector<8x32xf32>
    %100 = arith.divf %95, %99 : vector<8x32xf32>
    %101 = vector.broadcast %3 : vector<1x32xf32> to vector<8x32xf32>
    %102 = arith.addf %100, %101 : vector<8x32xf32>
    %103 = arith.truncf %102 : vector<8x32xf32> to vector<8x32xbf16>
    %cst_51 = arith.constant dense<0.000000e+00> : vector<8x64xf32>
    %104 = tpu.matmul %103, %11, %cst_51 {dimension_numbers = #tpu.dot_dimension_numbers<[1], [0], [0], [1], [0, 0, 1, 1], [], []>} : vector<8x32xbf16>, vector<32x64xbf16>, vector<8x64xf32> -> vector<8x64xf32>
    %105 = vector.broadcast %12 : vector<1x64xf32> to vector<8x64xf32>
    %106 = arith.addf %104, %105 : vector<8x64xf32>
    %cst_52 = arith.constant 0.000000e+00 : f32
    %107 = vector.broadcast %cst_52 : f32 to vector<8x64xf32>
    %108 = arith.maximumf %106, %107 : vector<8x64xf32>
    %109 = arith.truncf %108 : vector<8x64xf32> to vector<8x64xbf16>
    %cst_53 = arith.constant dense<0.000000e+00> : vector<8x32xf32>
    %110 = tpu.matmul %109, %14, %cst_53 {dimension_numbers = #tpu.dot_dimension_numbers<[1], [0], [0], [1], [0, 0, 1, 1], [], []>} : vector<8x64xbf16>, vector<64x32xbf16>, vector<8x32xf32> -> vector<8x32xf32>
    %111 = vector.broadcast %15 : vector<1x32xf32> to vector<8x32xf32>
    %112 = arith.addf %110, %111 : vector<8x32xf32>
    %113 = arith.addf %80, %112 : vector<8x32xf32>
    %c0_54 = arith.constant 0 : index
    %c0_55 = arith.constant 0 : index
    %c0_56 = arith.constant 0 : index
    %114 = vector.load %arg15[%c0_54, %c0_55, %c0_56] : memref<1x8x32xf32, #tpu.memory_space<vmem>>, vector<1x8x32xf32>
    %115 = vector.shape_cast %114 : vector<1x8x32xf32> to vector<8x32xf32>
    %116 = vector.shape_cast %113 : vector<8x32xf32> to vector<1x8x32xf32>
    tpu.vector_store %arg15[%c0_54, %c0_55, %c0_56], %116 {strides = array<i32>} : memref<1x8x32xf32, #tpu.memory_space<vmem>>, vector<1x8x32xf32>,
    return
  }
  func.func @transform_0(%arg0: i32) -> (i32, i32, i32) {
    %c0_i32 = arith.constant 0 : i32
    %c0_i32_0 = arith.constant 0 : i32
    %c0_i32_1 = arith.constant 0 : i32
    return %arg0, %c0_i32, %c0_i32_0 : i32, i32, i32
  }
  func.func @transform_1(%arg0: i32) -> (i32, i32, i32) {
    %c0_i32 = arith.constant 0 : i32
    %c0_i32_0 = arith.constant 0 : i32
    %c0_i32_1 = arith.constant 0 : i32
    return %arg0, %c0_i32, %c0_i32_0 : i32, i32, i32
  }
  func.func @transform_2(%arg0: i32) -> (i32, i32) {
    %c0_i32 = arith.constant 0 : i32
    %c0_i32_0 = arith.constant 0 : i32
    %c0_i32_1 = arith.constant 0 : i32
    return %c0_i32, %c0_i32_0 : i32, i32
  }
  func.func @transform_3(%arg0: i32) -> (i32, i32) {
    %c0_i32 = arith.constant 0 : i32
    %c0_i32_0 = arith.constant 0 : i32
    %c0_i32_1 = arith.constant 0 : i32
    return %c0_i32, %c0_i32_0 : i32, i32
  }
  func.func @transform_4(%arg0: i32) -> (i32, i32, i32) {
    %c0_i32 = arith.constant 0 : i32
    %c0_i32_0 = arith.constant 0 : i32
    %c0_i32_1 = arith.constant 0 : i32
    %c0_i32_2 = arith.constant 0 : i32
    return %c0_i32, %c0_i32_0, %c0_i32_1 : i32, i32, i32
  }
  func.func @transform_5(%arg0: i32) -> (i32, i32, i32) {
    %c0_i32 = arith.constant 0 : i32
    %c0_i32_0 = arith.constant 0 : i32
    %c0_i32_1 = arith.constant 0 : i32
    %c0_i32_2 = arith.constant 0 : i32
    return %c0_i32, %c0_i32_0, %c0_i32_1 : i32, i32, i32
  }
  func.func @transform_6(%arg0: i32) -> (i32, i32, i32) {
    %c0_i32 = arith.constant 0 : i32
    %c0_i32_0 = arith.constant 0 : i32
    %c0_i32_1 = arith.constant 0 : i32
    %c0_i32_2 = arith.constant 0 : i32
    return %c0_i32, %c0_i32_0, %c0_i32_1 : i32, i32, i32
  }
  func.func @transform_7(%arg0: i32) -> (i32, i32) {
    %c0_i32 = arith.constant 0 : i32
    %c0_i32_0 = arith.constant 0 : i32
    %c0_i32_1 = arith.constant 0 : i32
    return %c0_i32, %c0_i32_0 : i32, i32
  }
  func.func @transform_8(%arg0: i32) -> (i32, i32) {
    %c0_i32 = arith.constant 0 : i32
    %c0_i32_0 = arith.constant 0 : i32
    %c0_i32_1 = arith.constant 0 : i32
    return %c0_i32, %c0_i32_0 : i32, i32
  }
  func.func @transform_9(%arg0: i32) -> (i32, i32) {
    %c0_i32 = arith.constant 0 : i32
    %c0_i32_0 = arith.constant 0 : i32
    %c0_i32_1 = arith.constant 0 : i32
    return %c0_i32, %c0_i32_0 : i32, i32
  }
  func.func @transform_10(%arg0: i32) -> (i32, i32) {
    %c0_i32 = arith.constant 0 : i32
    %c0_i32_0 = arith.constant 0 : i32
    %c0_i32_1 = arith.constant 0 : i32
    return %c0_i32, %c0_i32_0 : i32, i32
  }
  func.func @transform_11(%arg0: i32) -> (i32, i32) {
    %c0_i32 = arith.constant 0 : i32
    %c0_i32_0 = arith.constant 0 : i32
    %c0_i32_1 = arith.constant 0 : i32
    return %c0_i32, %c0_i32_0 : i32, i32
  }
  func.func @transform_12(%arg0: i32) -> (i32, i32) {
    %c0_i32 = arith.constant 0 : i32
    %c0_i32_0 = arith.constant 0 : i32
    %c0_i32_1 = arith.constant 0 : i32
    return %c0_i32, %c0_i32_0 : i32, i32
  }
  func.func @transform_13(%arg0: i32) -> (i32, i32) {
    %c0_i32 = arith.constant 0 : i32
    %c0_i32_0 = arith.constant 0 : i32
    %c0_i32_1 = arith.constant 0 : i32
    return %c0_i32, %c0_i32_0 : i32, i32
  }
  func.func @transform_14(%arg0: i32) -> (i32, i32, i32) {
    %c0_i32 = arith.constant 0 : i32
    %c0_i32_0 = arith.constant 0 : i32
    %c0_i32_1 = arith.constant 0 : i32
    return %arg0, %c0_i32, %c0_i32_0 : i32, i32, i32
  }
}

</mosaic_0001>

<bundles_post_ra>
// kernel: tpu_custom_call.1
= control target key start
LH: loop header
LB: loop body
LE: loop exit
PB: predicated region body
PF: predicated region fallthrough
CT: control target
= control target key end

     0   :  { %s2448_s0 = inlined_call_operand.vmem [shape: f32[2,8,32], index: 0, kind: input, shape index: {}]   ;;  %s2449_s1 = inlined_call_operand.vmem [shape: f32[2,1,8], index: 1, kind: input, shape index: {}]   ;;  %s2450_s2 = inlined_call_operand.vmem [shape: f32[1,32], index: 2, kind: input, shape index: {}]   ;;  %s2451_s3 = inlined_call_operand.vmem [shape: f32[1,32], index: 3, kind: input, shape index: {}]   ;;  %s2452_s4 = inlined_call_operand.vmem [shape: f32[4,32,24], index: 4, kind: input, shape index: {}]   ;;  %s2453_s5 = inlined_call_operand.vmem [shape: f32[4,1,24], index: 5, kind: input, shape index: {}]   ;;  %s2454_s6 = inlined_call_operand.vmem [shape: f32[4,8,32], index: 6, kind: input, shape index: {}]   ;;  %s2455_s7 = inlined_call_operand.vmem [shape: f32[1,32], index: 7, kind: input, shape index: {}]   ;;  %s2456_s8 = inlined_call_operand.vmem [shape: f32[1,32], index: 8, kind: input, shape index: {}]   ;;  %s2457_s9 = inlined_call_operand.vmem [shape: f32[1,32], index: 9, kind: input, shape index: {}]   ;;  %s2458_s10 = inlined_call_operand.vmem [shape: f32[32,64], index: 10, kind: input, shape index: {}]   ;;  %s2459_s11 = inlined_call_operand.vmem [shape: f32[1,64], index: 11, kind: input, shape index: {}]   ;;  %s2460_s12 = inlined_call_operand.vmem [shape: f32[64,32], index: 12, kind: input, shape index: {}]   ;;  %s2461_s13 = inlined_call_operand.vmem [shape: f32[1,32], index: 13, kind: input, shape index: {}]   ;;  %s2462_s14 = inlined_call_operand.hbm [shape: f32[2,8,32], index: 14, kind: output, shape index: {}]  }
   0x1   :  { %2466 = sst [smem:[#allocation8_spill]] %s2448_s0 }
   0x2   :  { %19 = vsyncpa [#allocation3], 0 }
   0x3   :  { %21 = vsyncpa [#allocation3 + $0x1], 0  ;;  %s2066_s29 = smov 0   ;;  %s2068_s30 = smov 0  }
   0x4   :  { %s2070_s15 = smov 0   ;;  %s2072_s16 = smov 0  }
   0x5 LB: > { %2467 = sst [smem:[#allocation5_spill]] %s1979_s15  ;;  %s2087_s17 = sadd.s32 4294967295, %s1983_s16   ;;  %s1983_s16 = sphi %s2072_s16, %s2473_s16   ;;  %s1979_s15 = sphi %s2070_s15, %s2475_s15   ;;  %s1975_s30 = sphi %s2068_s30, %s2477_s30   ;;  %s1971_s29 = sphi %s2066_s29, %s2476_s29  }
   0x6   : > { %s1646_s18 = sadd.s32 4294967294, %s1983_s16   ;;  %s2091_s19 = sadd.s32 1, %s1983_s16  }
   0x7   : > { %2468 = sst [smem:[#allocation6_spill]] %s2091_s19  ;;  %s338_s20 = sadd.s32 1, %s1979_s15 }
   0x8   : > { %s335_s21 = ssub.s32 %s1983_s16, %s2091_s19  ;;  %p348_p0 = scmp.ne.s32.totalorder %s1979_s15, %s1975_s30 }
   0x9   : > { %p336_p1 = scmp.eq.s32.totalorder %s335_s21, 0  ;;  %p349_p2 = scmp.eq.s32.totalorder %s2087_s17, 1 }
   0xa   : > { %p354_p3 = scmp.ne.s32.totalorder %s1975_s30, %s1971_s29  ;;  %p355_p4 = scmp.eq.s32.totalorder %s1646_s18, 1 }
   0xb   : > { %s2102_s22 = scalar_select %p336_p1, %s1979_s15, %s338_s20  }
   0xc   : > { %p2104_p5 = por %p349_p2, %p348_p0  ;;  %p2108_p6 = por %p355_p4, %p354_p3 }
   0xd   : > { %2469 = sst [smem:[#allocation7_spill]] %s2102_s22  ;;  %p1649_p7 = scmp.ge.s32.totalorder %s1983_s16, 1 }
   0xe   : > { %p422_p8 = scmp.lt.s32.totalorder %s1983_s16, 3 }
  0x10   : > { %p423_p9 = pnand %p1649_p7, %p422_p8 }
  0x11   : > { %p470_p10 = scmp.lt.s32.totalorder (!%p423_p9), %s2087_s17, 1  ;;  %vm542_vm0 = vcmask (!%p423_p9), 261120   ;;  %s2472_s0 = sld [smem:[#allocation8_spill]] (!%p423_p9)  ;;  %v482_v7 = vld [vmem:[%s2452_s4] sm:$0xff] (!%p423_p9)  ;;  %v483_v8 = vld [vmem:[%s2452_s4 + $0x8] sm:$0xff] (!%p423_p9)  ;;  %v1985_v10 = vmov (!%p423_p9), 0.0  }
  0x12   : > { %426 = sbr.rel (%p423_p9) target bundleno = 2449 (0x991), region = 76  ;;  %v486_v9 = vld [vmem:[%s2452_s4 + $0x20] sm:$0xff] (!%p423_p9)  ;;  %1729 = vmatprep.subr.bf16.mxu0 (!%p423_p9), %v1985_v10  ;;  %1737 = vmatprep.subr.bf16.mxu1 (!%p423_p9), %v1985_v10  ;;  %v498_v11 = vpack.c.bf16 (!%p423_p9), %v483_v8, %v482_v7  ;;  %v487_v12 = vld [vmem:[%s2452_s4 + $0x28] sm:$0xff] (!%p423_p9)  ;;  %v484_v13 = vld [vmem:[%s2452_s4 + $0x10] sm:$0xff] (!%p423_p9)  ;;  %vm1986_vm1 = vmmov (!%p423_p9), 0   ;;  %s1987_s20 = smov (!%p423_p9), 120  }
  0x13   : > { %v485_v14 = vld [vmem:[%s2452_s4 + $0x18] sm:$0xff] (!%p423_p9)  ;;  %v500_v15 = vpack.c.bf16 (!%p423_p9), %v487_v12, %v486_v9  ;;  %v488_v16 = vld [vmem:[%s2452_s4 + $0x30] sm:$0xff] (!%p423_p9)  ;;  %1733 = vmatprep.mubr.msk.bf16.mxu0 (!%p423_p9), %vm1986_vm1, %v1985_v10  ;;  %1741 = vmatprep.mubr.msk.bf16.mxu1 (!%p423_p9), %vm1986_vm1, %v1985_v10  ;;  %v1652_v28 = vld [vmem:[%s2450_s2] ss:$0 sm:$0xff] (!%p423_p9)  ;;  %vm774_vm4 = vcmask (!%p423_p9), 64512   ;;  %vm1035_vm7 = vcmask (!%p423_p9), 1043456  }
  0x14   : > { %v489_v17 = vld [vmem:[%s2452_s4 + $0x38] sm:$0xff] (!%p423_p9)  ;;  %1730 = vmatpush3.bf16.msra.mxu0 (!%p423_p9), %v498_v11  ;;  %v499_v18 = vpack.c.bf16 (!%p423_p9), %v485_v14, %v484_v13  ;;  %v1653_v31 = vld [vmem:[%s2451_s3] ss:$0 sm:$0xff] (!%p423_p9)  ;;  %v491_v34 = vld [vmem:[%s2452_s4 + $0x48] sm:$0xff] (!%p423_p9)  ;;  %vm1518_vm10 = vcmask (!%p423_p9), 523264   ;;  %s1682_s19 = sshll.u32 (!%p423_p9), %s2087_s17, 7 }
  0x15   : > { %1738 = vmatpush3.bf16.msra.mxu1 (!%p423_p9), %v500_v15  ;;  %1731 = vmatprep.subr.bf16.mxu0 (!%p423_p9), %v1985_v10  ;;  %v501_v19 = vpack.c.bf16 (!%p423_p9), %v489_v17, %v488_v16  ;;  %v490_v32 = vld [vmem:[%s2452_s4 + $0x40] sm:$0xff] (!%p423_p9)  ;;  %v495_v36 = vld [vmem:[%s2452_s4 + $0x68] sm:$0xff] (!%p423_p9)  ;;  %v492_v40 = vld [vmem:[%s2452_s4 + $0x50] sm:$0xff] (!%p423_p9) }
  0x16   : > { %1739 = vmatprep.subr.bf16.mxu1 (!%p423_p9), %v1985_v10  ;;  %v494_v35 = vld [vmem:[%s2452_s4 + $0x60] sm:$0xff] (!%p423_p9)  ;;  %v502_v38 = vpack.c.bf16 (!%p423_p9), %v491_v34, %v490_v32  ;;  %v493_v42 = vld [vmem:[%s2452_s4 + $0x58] sm:$0xff] (!%p423_p9)  ;;  %v496_v43 = vld [vmem:[%s2452_s4 + $0x70] sm:$0xff] (!%p423_p9) }
  0x17   : > { %v504_v39 = vpack.c.bf16 (!%p423_p9), %v495_v36, %v494_v35  ;;  %v497_v44 = vld [vmem:[%s2452_s4 + $0x78] sm:$0xff] (!%p423_p9)  ;;  %v503_v45 = vpack.c.bf16 (!%p423_p9), %v493_v42, %v492_v40  ;;  %v1654_v47 = vld [vmem:[%s2453_s5] ss:$0 sm:$0xff] (!%p423_p9)  ;;  %v1655_v49 = vld [vmem:[%s2453_s5 + $0x1] ss:$0 sm:$0xff] (!%p423_p9) }
  0x18   : > { %1732 = vmatpush3.bf16.msra.mxu0 (!%p423_p9), %v499_v18  ;;  %v505_v46 = vpack.c.bf16 (!%p423_p9), %v497_v44, %v496_v43  ;;  %v1656_v60 = vld [vmem:[%s2453_s5 + $0x2] ss:$0 sm:$0xff] (!%p423_p9)  ;;  %v1657_v61 = vld [vmem:[%s2453_s5 + $0x3] ss:$0 sm:$0xff] (!%p423_p9) }
  0x19   : > { %s2116_s25 = scalar_select %p470_p10, %s2087_s17, 1  ;;  %1740 = vmatpush3.bf16.msra.mxu1 %v501_v19  ;;  %1745 = vmatprep.subr.bf16.mxu0 %v1985_v10 }
  0x1a   : > { %1753 = vmatprep.subr.bf16.mxu1 %v1985_v10 }
  0x1b   : > { %s1651_s26 = sshll.u32 %s2116_s25, 3  ;;  %s476_s15 = scalar_lea.vmem %s2449_s1, %s2116_s25 }
  0x1c   : > { %s473_s18 = scalar_lea.vmem %s2472_s0, %s1651_s26  ;;  %s1989_s25 = smov 112  }
  0x1d   : > { %v2122_v0 = vld [vmem:[%s473_s18] sm:$0xff]  ;;  %s467_s18 = sand.u32 1, %s1975_s30   ;;  %s2405_s26 = scalar_lea.hbm %s2462_s14, %s1682_s19 }
  0x1e   : > { %v543_v1 = vsel %vm542_vm0, %v2122_v0, 0.0  ;;  %s1650_s0 = sshll.u32 %s467_s18, 3  ;;  %s1565_s17 = scalar_lea.sflag [#allocation3], %s467_s18 }
  0x1f   : > { %544 = vadd.xlane.f32.xlu0 %v543_v1  ;;  %s469_s22 = scalar_lea.vmem [#allocation2], %s1650_s0  ;;  %s1990_s0 = smov [#allocation2]  }
  0xac   : > { %v545_v2 = vpop.xlane.xlu0 %544 }
  0xad   : > { %v547_v3 = vmul.f32 0.03125, %v545_v2 }
  0xaf   : > { %v548_v4 = vsub.f32 %v2122_v0, %v547_v3 }
  0xb1   : > { %v549_v5 = vmul.f32 %v548_v4, %v548_v4  ;;  %v561_v29 = vmul.f32 %v1652_v28, %v548_v4 }
  0xb3   : > { %v550_v6 = vsel %vm542_vm0, %v549_v5, 0.0 }
  0xb4   : > { %551 = vadd.xlane.f32.xlu0 %v550_v6 }
 0x141   : > { %v552_v20 = vpop.xlane.xlu0 %551 }
 0x142   : > { %v554_v21 = vmul.f32 0.032258064, %v552_v20 }
 0x144   : > { %1897 = vrsqrt.f32 %v554_v21  ;;  %vm564_vm2 = vcmp.eq.f32.partialorder %v554_v21, inf  ;;  %v567_v24 = vand.u32 2147483648, %v554_v21  ;;  %vm566_vm3 = vcmp.eq.f32.partialorder %v554_v21, 0.0 }
 0x14e   : > { %v1898_v22 = vpop.eup %1897 }
 0x14f   : > { %v563_v23 = vmul.f32 %v1898_v22, %v554_v21  ;;  %v540_v22 = vld [vmem:[%s476_s15] sm:$0x1]  ;;  %s1925_s15 = sshll.u32 %s1990_s0, 4  ;;  %s1926_s15 = int_to_ptr.vmem [resolvable:$false] %s1925_s15 }
 0x150   : > { %vm541_vm5 = vcmp.eq.f32.partialorder %v540_v22, 0.0 }
 0x151   : > { %v565_v25 = vsel %vm564_vm2, %v554_v21, %v563_v23  ;;  %v973_v21 = vlaneseq }
 0x152   : > { %v568_v26 = vsel %vm566_vm3, %v567_v24, %v565_v25  ;;  %v1988_v25 = vmov 0  }
 0x153   : > { %v569_v27 = vadd.f32 1e-06, %v568_v26  ;;  %v974_v23 = vshrl.u32 %v973_v21, 7  ;;  %v972_v26 = vsel %vm541_vm5, 1, %v1988_v25 }
 0x155   : > { %1899 = vrcp.f32 %v569_v27  ;;  %v975_v24 = vsub.s32 0, %v974_v23 }
 0x157   : > { %v976_v27 = vrot.slane %v972_v26, %v975_v24 }
 0x159   : > { %vm977_vm6 = vcmp.eq.s32.totalorder %v976_v27, 1 }
 0x15f   : > { %v1900_v30 = vpop.eup %1899 }
 0x160   : > { %v571_v33 = vmul.f32 %v1900_v30, %v561_v29 }
 0x162   : > { %v578_v37 = vadd.f32 %v1653_v31, %v571_v33 }
 0x164   : > { %v579_v41 = vpack.c.bf16 %v578_v37, %v578_v37 }
 0x166   : > { %1734 = vmatmul.mubr.msk.bf16.vlgmr.msra.gmra.mrb[0].mxu0 %vm542_vm0, %v579_v41  ;;  %1742 = vmatmul.mubr.msk.bf16.vlgmr.msra.gmra.mrb[0].mxu1 %vm542_vm0, %v579_v41 }
 0x167   : > { %1746 = vmatpush3.bf16.msra.mxu0 %v502_v38  ;;  %1754 = vmatpush3.bf16.msra.mxu1 %v504_v39 }
 0x168   : > { %1747 = vmatprep.subr.bf16.mxu0 %v1985_v10  ;;  %1755 = vmatprep.subr.bf16.mxu1 %v1985_v10 }
 0x169   : > { %1749 = vmatprep.mubr.msk.bf16.mxu0 %vm1986_vm1, %v1985_v10  ;;  %1757 = vmatprep.mubr.msk.bf16.mxu1 %vm1986_vm1, %v1985_v10 }
 0x16b   : > { %1748 = vmatpush3.bf16.msra.mxu0 %v503_v45  ;;  %1756 = vmatpush3.bf16.msra.mxu1 %v505_v46 }
 0x16c   : > { %1761 = vmatprep.subr.bf16.mxu0 %v1985_v10  ;;  %1767 = vmatprep.subr.bf16.mxu1 %v1985_v10 }
 0x16e   : > { %1750 = vmatmul.mubr.msk.bf16.vlgmr.msra.gmra.mrb[4].mxu0 %vm542_vm0, %v579_v41  ;;  %1758 = vmatmul.mubr.msk.bf16.vlgmr.msra.gmra.mrb[4].mxu1 %vm542_vm0, %v579_v41 }
 0x16f   : > { %1763 = vmatprep.mubr.msk.bf16.mxu0 %vm1986_vm1, %v1985_v10  ;;  %1769 = vmatprep.mubr.msk.bf16.mxu1 %vm1986_vm1, %v1985_v10 }
 0x239   : > { %v641_v48 = vpop.f32.mrb[0].mxu0  ;;  %v681_v50 = vpop.f32.mrb[0].mxu1 }
 0x23a   : > { %v642_v51 = vadd.f32 %v1654_v47, %v641_v48  ;;  %v1735_v52 = vpop.f32.mrb[1].mxu0  ;;  %v1743_v53 = vpop.f32.mrb[1].mxu1  ;;  %v682_v57 = vadd.f32 %v1655_v49, %v681_v50 }
 0x23b   : > { %v644_v54 = vpop.f32.mrb[2].mxu0  ;;  %v684_v55 = vpop.f32.mrb[2].mxu1 }
 0x23c   : > { %v2214_v56 = vpack.c.bf16 %v642_v51, %v642_v51  ;;  %v1736_v58 = vpop.f32.mrb[3].mxu0  ;;  %v1744_v59 = vpop.f32.mrb[3].mxu1  ;;  %v2223_v62 = vpack.c.bf16 %v682_v57, %v682_v57 }
 0x23e   : > { %772 = vrot.lane.b32.xlu1 %v2214_v56, %s1987_s20 }
 0x241   : > { %v721_v63 = vpop.f32.mrb[4].mxu0  ;;  %v761_v1 = vpop.f32.mrb[4].mxu1 }
 0x242   : > { %v722_v2 = vadd.f32 %v1656_v60, %v721_v63  ;;  %v762_v3 = vadd.f32 %v1657_v61, %v761_v1  ;;  %v1759_v4 = vpop.f32.mrb[5].mxu1  ;;  %822 = vrot.lane.b32.xlu1 %v2223_v62, %s1987_s20  ;;  %v1751_v5 = vpop.f32.mrb[5].mxu0 }
 0x243   : > { %v724_v6 = vpop.f32.mrb[6].mxu0  ;;  %v764_v7 = vpop.f32.mrb[6].mxu1 }
 0x244   : > { %v2226_v8 = vpack.c.bf16 %v722_v2, %v722_v2  ;;  %v2228_v9 = vpack.c.bf16 %v762_v3, %v762_v3  ;;  %v1752_v11 = vpop.f32.mrb[7].mxu0  ;;  %v1760_v12 = vpop.f32.mrb[7].mxu1 }
 0x246   : > { %920 = vrot.lane.b32.xlu1 %v2228_v9, %s1987_s20  ;;  %871 = vrot.lane.b32.xlu0 %v2226_v8, %s1987_s20  ;;  %s1578_s20 = sshll.u32 %s469_s22, 4  ;;  %s2407_s20 = int_to_ptr.vmem [resolvable:$true] %s1578_s20 }
 0x247   : > { %s1921_s28 = scalar_lea.vmem %s2407_s20, 128  ;;  %p1928_p0 = scmp.lt.s32.totalorder %s2407_s20, %s1926_s15 }
 0x248   : > { %p1922_p11 = scmp.ne.s32.totalorder %s2407_s20, %s1921_s28 }
 0x24a   : > { %p1923_p12 = pnand %p1922_p11, %p2104_p5 }
 0x24c   : > { %p1924_p13 = pneg %p1923_p12 }
 0x2b0   : > { %v773_v13 = vpop.permute.xlu1 %772 }
 0x2b1   : > { %v779_v14 = vsel %vm774_vm4, %v773_v13, 0 }
 0x2b2   : > { %1762 = vmatpush3.bf16.xpose.msra.mxu0 %v779_v14 }
 0x2b3   : > { %1773 = vmatprep.subr.bf16.mxu0 %v1985_v10 }
 0x2b4   : > { %v823_v15 = vpop.permute.xlu1 %822 }
 0x2b5   : > { %v828_v16 = vsel %vm774_vm4, %v823_v15, 0 }
 0x2b6   : > { %1768 = vmatpush3.bf16.xpose.msra.mxu1 %v828_v16 }
 0x2b7   : > { %1779 = vmatprep.subr.bf16.mxu1 %v1985_v10 }
 0x2b8   : > { %v872_v17 = vpop.permute.xlu0 %871  ;;  %v921_v19 = vpop.permute.xlu1 %920 }
 0x2b9   : > { %v877_v18 = vsel %vm774_vm4, %v872_v17, 0  ;;  %1764 = vmatmul.mubr.msk.bf16.vlgmr.msra.gmra.mrb[8].mxu0 %vm774_vm4, %v2214_v56  ;;  %v926_v20 = vsel %vm774_vm4, %v921_v19, 0 }
 0x2ba   : > { %1774 = vmatpush3.bf16.xpose.msra.mxu0 %v877_v18  ;;  %1775 = vmatprep.mubr.msk.bf16.mxu0 %vm1986_vm1, %v1985_v10 }
 0x2bb   : > { %1785 = vmatprep.subr.bf16.mxu0 %v1985_v10 }
 0x2bd   : > { %1770 = vmatmul.mubr.msk.bf16.vlgmr.msra.gmra.mrb[8].mxu1 %vm774_vm4, %v2223_v62 }
 0x2be   : > { %1780 = vmatpush3.bf16.xpose.msra.mxu1 %v926_v20  ;;  %1781 = vmatprep.mubr.msk.bf16.mxu1 %vm1986_vm1, %v1985_v10 }
 0x2bf   : > { %1791 = vmatprep.subr.bf16.mxu1 %v1985_v10 }
 0x2c1   : > { %1776 = vmatmul.mubr.msk.bf16.vlgmr.msra.gmra.mrb[12].mxu0 %vm774_vm4, %v2226_v8 }
 0x2c2   : > { %1787 = vmatprep.mubr.msk.bf16.mxu0 %vm1986_vm1, %v1985_v10 }
 0x2c5   : > { %1782 = vmatmul.mubr.msk.bf16.vlgmr.msra.gmra.mrb[12].mxu1 %vm774_vm4, %v2228_v9 }
 0x2c6   : > { %1793 = vmatprep.mubr.msk.bf16.mxu1 %vm1986_vm1, %v1985_v10 }
 0x38c   : > { %v815_v28 = vpop.f32.mrb[8].mxu0 }
 0x38d   : > { %v968_v29 = vmul.f32 0.35355338, %v815_v28  ;;  %v1765_v30 = vpop.f32.mrb[9].mxu0  ;;  %v510_v28 = vld [vmem:[%s2454_s6] sm:$0xff] }
 0x38e   : > { %v818_v31 = vpop.f32.mrb[10].mxu0 }
 0x38f   : > { %v1766_v32 = vpop.f32.mrb[11].mxu0  ;;  %v978_v33 = vsel %vm977_vm6, -1e+09, %v968_v29 }
 0x390   : > { %v864_v34 = vpop.f32.mrb[8].mxu1  ;;  %v982_v35 = vsel %vm774_vm4, %v978_v33, -inf  ;;  %v514_v32 = vpack.c.bf16 %v510_v28, %v510_v28  ;;  %v1674_v28 = vld [vmem:[%s2455_s7] ss:$0 sm:$0xff] }
 0x391   : > { %v969_v36 = vmul.f32 0.35355338, %v864_v34  ;;  %v1771_v37 = vpop.f32.mrb[9].mxu1  ;;  %983 = vmax.xlane.f32.xlu1 %v982_v35 }
 0x392   : > { %v867_v38 = vpop.f32.mrb[10].mxu1  ;;  %v1231_v37 = vsel %vm1035_vm7, %v514_v32, 0 }
 0x393   : > { %v1772_v39 = vpop.f32.mrb[11].mxu1  ;;  %v979_v40 = vsel %vm977_vm6, -1e+09, %v969_v36 }
 0x394   : > { %v913_v41 = vpop.f32.mrb[12].mxu0  ;;  %v985_v42 = vsel %vm774_vm4, %v979_v40, -inf }
 0x395   : > { %v970_v43 = vmul.f32 0.35355338, %v913_v41  ;;  %986 = vmax.xlane.f32.xlu0 %v985_v42  ;;  %v1777_v44 = vpop.f32.mrb[13].mxu0  ;;  %v511_v41 = vld [vmem:[%s2454_s6 + $0x8] sm:$0xff] }
 0x396   : > { %v916_v45 = vpop.f32.mrb[14].mxu0  ;;  %v515_v42 = vpack.c.bf16 %v511_v41, %v511_v41  ;;  %v512_v44 = vld [vmem:[%s2454_s6 + $0x10] sm:$0xff] }
 0x397   : > { %v1778_v46 = vpop.f32.mrb[15].mxu0  ;;  %v980_v47 = vsel %vm977_vm6, -1e+09, %v970_v43  ;;  %v516_v45 = vpack.c.bf16 %v512_v44, %v512_v44  ;;  %v521_v41 = vld [vmem:[%s2458_s10 + $0x10] sm:$0xff] }
 0x398   : > { %v962_v48 = vpop.f32.mrb[12].mxu1  ;;  %v988_v49 = vsel %vm774_vm4, %v980_v47, -inf  ;;  %v1277_v43 = vsel %vm1035_vm7, %v515_v42, 0  ;;  %v513_v46 = vld [vmem:[%s2454_s6 + $0x18] sm:$0xff] }
 0x399   : > { %v971_v50 = vmul.f32 0.35355338, %v962_v48  ;;  %v1783_v51 = vpop.f32.mrb[13].mxu1  ;;  %989 = vmax.xlane.f32.xlu1 %v988_v49 }
 0x39a   : > { %v965_v52 = vpop.f32.mrb[14].mxu1  ;;  %v517_v51 = vpack.c.bf16 %v513_v46, %v513_v46  ;;  %v527_v46 = vld [vmem:[%s2460_s12 + $0x8] sm:$0xff] }
 0x39b   : > { %v1784_v53 = vpop.f32.mrb[15].mxu1  ;;  %v981_v54 = vsel %vm977_vm6, -1e+09, %v971_v50  ;;  %v1323_v50 = vsel %vm1035_vm7, %v516_v45, 0  ;;  %v526_v45 = vld [vmem:[%s2460_s12] sm:$0xff] }
 0x39c   : > { %v991_v55 = vsel %vm774_vm4, %v981_v54, -inf }
 0x39d   : > { %992 = vmax.xlane.f32.xlu1 %v991_v55 }
 0x3ab   : > { %1030 = vrot.lane.b32.xlu0 %v2214_v56, %s1989_s25 }
 0x3ae   : > { %1079 = vrot.lane.b32.xlu1 %v2223_v62, %s1989_s25 }
 0x41e   : > { %v984_v57 = vpop.xlane.xlu1 %983 }
 0x41f   : > { %v994_v58 = vsub.f32 %v978_v33, %v984_v57 }
 0x421   : > { %v998_v59 = vmul.f32 1.442695, %v994_v58  ;;  %v1369_v58 = vsel %vm1035_vm7, %v517_v51, 0 }
 0x422   : > { %v987_v60 = vpop.xlane.xlu0 %986 }
 0x423   : > { %1901 = vpow2.f32 %v998_v59  ;;  %v995_v61 = vsub.f32 %v979_v40, %v987_v60 }
 0x425   : > { %v1000_v63 = vmul.f32 1.442695, %v995_v61 }
 0x426   : > { %v1031_v1 = vpop.permute.xlu0 %1030  ;;  %v990_v2 = vpop.xlane.xlu1 %989 }
 0x427   : > { %1903 = vpow2.f32 %v1000_v63  ;;  %v1037_v3 = vsel %vm1035_vm7, %v1031_v1, 0  ;;  %v996_v4 = vsub.f32 %v980_v47, %v990_v2 }
 0x428   : > { %1786 = vmatpush3.bf16.msra.mxu0 %v1037_v3 }
 0x429   : > { %v1002_v5 = vmul.f32 1.442695, %v996_v4  ;;  %1797 = vmatprep.subr.bf16.mxu0 %v1985_v10 }
 0x42a   : > { %v993_v56 = vpop.xlane.xlu1 %992 }
 0x42b   : > { %1905 = vpow2.f32 %v1002_v5  ;;  %v997_v62 = vsub.f32 %v981_v54, %v993_v56 }
 0x42d   : > { %v1902_v6 = vpop.eup %1901  ;;  %v1004_v7 = vmul.f32 1.442695, %v997_v62 }
 0x42e   : > { %v1080_v11 = vpop.permute.xlu1 %1079  ;;  %v1006_v12 = vsel %vm774_vm4, %v1902_v6, 0.0 }
 0x42f   : > { %1907 = vpow2.f32 %v1004_v7  ;;  %v1085_v13 = vsel %vm1035_vm7, %v1080_v11, 0  ;;  %1007 = vadd.xlane.f32.xlu1 %v1006_v12 }
 0x430   : > { %1792 = vmatpush3.bf16.msra.mxu1 %v1085_v13 }
 0x431   : > { %v1904_v14 = vpop.eup %1903  ;;  %1803 = vmatprep.subr.bf16.mxu1 %v1985_v10 }
 0x432   : > { %v1009_v15 = vsel %vm774_vm4, %v1904_v14, 0.0 }
 0x433   : > { %1010 = vadd.xlane.f32.xlu1 %v1009_v15 }
 0x435   : > { %v1906_v16 = vpop.eup %1905 }
 0x436   : > { %v1012_v17 = vsel %vm774_vm4, %v1906_v16, 0.0 }
 0x437   : > { %1013 = vadd.xlane.f32.xlu0 %v1012_v17 }
 0x439   : > { %v1908_v18 = vpop.eup %1907 }
 0x43a   : > { %v1015_v19 = vsel %vm774_vm4, %v1908_v18, 0.0 }
 0x43b   : > { %1016 = vadd.xlane.f32.xlu1 %v1015_v19 }
 0x44c   : > { %1127 = vrot.lane.b32.xlu1 %v2226_v8, %s1989_s25 }
 0x44d   : > { %1175 = vrot.lane.b32.xlu0 %v2228_v9, %s1989_s25  ;;  %s1927_s25 = scalar_lea.vmem %s1926_s15, 256 }
 0x44e   : > { %p1929_p1 = scmp.lt.s32.totalorder %s1927_s25, %s1921_s28 }
 0x450   : > { %p1930_p2 = por %p1929_p1, %p1928_p0 }
 0x452   : > { %p1931_p3 = pnand %p1930_p2, %p1924_p13 }
 0x4bc   : > { %v1008_v20 = vpop.xlane.xlu1 %1007 }
 0x4bd   : > { %1909 = vrcp.f32 %v1008_v20 }
 0x4c0   : > { %v1011_v21 = vpop.xlane.xlu1 %1010 }
 0x4c1   : > { %1911 = vrcp.f32 %v1011_v21 }
 0x4c4   : > { %v1014_v22 = vpop.xlane.xlu0 %1013 }
 0x4c5   : > { %1913 = vrcp.f32 %v1014_v22 }
 0x4c7   : > { %v1910_v23 = vpop.eup %1909 }
 0x4c8   : > { %v1022_v24 = vmul.f32 %v1910_v23, %v1902_v6  ;;  %v1017_v25 = vpop.xlane.xlu1 %1016  ;;  %v1176_v29 = vpop.permute.xlu0 %1175 }
 0x4c9   : > { %1915 = vrcp.f32 %v1017_v25  ;;  %v1181_v35 = vsel %vm1035_vm7, %v1176_v29, 0 }
 0x4ca   : > { %v1026_v26 = vpack.c.bf16 %v1022_v24, %v1022_v24 }
 0x4cb   : > { %v1912_v27 = vpop.eup %1911 }
 0x4cc   : > { %v1023_v8 = vmul.f32 %v1912_v27, %v1904_v14  ;;  %1788 = vmatmul.mubr.msk.bf16.vlgmr.msra.gmra.mrb[16].mxu0 %vm774_vm4, %v1026_v26  ;;  %v1128_v9 = vpop.permute.xlu1 %1127 }
 0x4cd   : > { %v1133_v30 = vsel %vm1035_vm7, %v1128_v9, 0  ;;  %1799 = vmatprep.mubr.msk.bf16.mxu0 %vm1986_vm1, %v1985_v10 }
 0x4ce   : > { %1798 = vmatpush3.bf16.msra.mxu0 %v1133_v30  ;;  %v1027_v31 = vpack.c.bf16 %v1023_v8, %v1023_v8 }
 0x4cf   : > { %v1914_v33 = vpop.eup %1913  ;;  %1809 = vmatprep.subr.bf16.mxu0 %v1985_v10 }
 0x4d0   : > { %v1024_v34 = vmul.f32 %v1914_v33, %v1906_v16  ;;  %1794 = vmatmul.mubr.msk.bf16.vlgmr.msra.gmra.mrb[16].mxu1 %vm774_vm4, %v1027_v31 }
 0x4d1   : > { %1804 = vmatpush3.bf16.msra.mxu1 %v1181_v35  ;;  %1805 = vmatprep.mubr.msk.bf16.mxu1 %vm1986_vm1, %v1985_v10 }
 0x4d2   : > { %v1028_v36 = vpack.c.bf16 %v1024_v34, %v1024_v34  ;;  %1815 = vmatprep.subr.bf16.mxu1 %v1985_v10 }
 0x4d3   : > { %v1916_v38 = vpop.eup %1915 }
 0x4d4   : > { %v1025_v39 = vmul.f32 %v1916_v38, %v1908_v18  ;;  %1800 = vmatmul.mubr.msk.bf16.vlgmr.msra.gmra.mrb[20].mxu0 %vm774_vm4, %v1028_v36 }
 0x4d5   : > { %1810 = vmatpush3.bf16.msra.mxu0 %v1231_v37  ;;  %1811 = vmatprep.mubr.msk.bf16.mxu0 %vm1986_vm1, %v1985_v10 }
 0x4d6   : > { %v1029_v40 = vpack.c.bf16 %v1025_v39, %v1025_v39  ;;  %1821 = vmatprep.subr.bf16.mxu0 %v1985_v10 }
 0x4d8   : > { %1806 = vmatmul.mubr.msk.bf16.vlgmr.msra.gmra.mrb[20].mxu1 %vm774_vm4, %v1029_v40  ;;  %v519_v40 = vld [vmem:[%s2458_s10] sm:$0xff] }
 0x4d9   : > { %1817 = vmatprep.mubr.msk.bf16.mxu1 %vm1986_vm1, %v1985_v10  ;;  %1816 = vmatpush3.bf16.msra.mxu1 %v1277_v43  ;;  %v522_v43 = vld [vmem:[%s2458_s10 + $0x18] sm:$0xff] }
 0x4da   : > { %1827 = vmatprep.subr.bf16.mxu1 %v1985_v10  ;;  %v524_v44 = vpack.c.bf16 %v522_v43, %v521_v41 }
 0x59f   : > { %v1073_v47 = vpop.f32.mrb[16].mxu0 }
 0x5a0   : > { %v1223_v48 = vpack.c.bf16 %v1073_v47, %v1073_v47  ;;  %v1789_v49 = vpop.f32.mrb[17].mxu0  ;;  %v528_v47 = vld [vmem:[%s2460_s12 + $0x10] sm:$0xff] }
 0x5a1   : > { %v1076_v52 = vpop.f32.mrb[18].mxu0  ;;  %v529_v49 = vld [vmem:[%s2460_s12 + $0x18] sm:$0xff] }
 0x5a2   : > { %v1790_v53 = vpop.f32.mrb[19].mxu0  ;;  %1812 = vmatmul.mubr.msk.bf16.vlgmr.msra.gmra.mrb[24].mxu0 %vm774_vm4, %v1223_v48  ;;  %v534_v48 = vpack.c.bf16 %v527_v46, %v526_v45 }
 0x5a3   : > { %v1121_v54 = vpop.f32.mrb[16].mxu1  ;;  %1822 = vmatpush3.bf16.msra.mxu0 %v1323_v50  ;;  %1823 = vmatprep.mubr.msk.bf16.mxu0 %vm1986_vm1, %v1985_v10  ;;  %v535_v50 = vpack.c.bf16 %v529_v49, %v528_v47 }
 0x5a4   : > { %v1224_v55 = vpack.c.bf16 %v1121_v54, %v1121_v54  ;;  %v1795_v57 = vpop.f32.mrb[17].mxu1  ;;  %1833 = vmatprep.subr.bf16.mxu0 %v1985_v10 }
 0x5a5   : > { %v1124_v59 = vpop.f32.mrb[18].mxu1 }
 0x5a6   : > { %v1796_v60 = vpop.f32.mrb[19].mxu1  ;;  %1818 = vmatmul.mubr.msk.bf16.vlgmr.msra.gmra.mrb[24].mxu1 %vm774_vm4, %v1224_v55 }
 0x5a7   : > { %v1169_v61 = vpop.f32.mrb[20].mxu0  ;;  %1828 = vmatpush3.bf16.msra.mxu1 %v1369_v58  ;;  %1829 = vmatprep.mubr.msk.bf16.mxu1 %vm1986_vm1, %v1985_v10  ;;  %v1675_v60 = vld [vmem:[%s2456_s8] ss:$0 sm:$0xff] }
 0x5a8   : > { %v1225_v63 = vpack.c.bf16 %v1169_v61, %v1169_v61  ;;  %v1801_v1 = vpop.f32.mrb[21].mxu0  ;;  %1841 = vmatprep.subr.bf16.mxu1 %v1985_v10 }
 0x5a9   : > { %v1172_v2 = vpop.f32.mrb[22].mxu0  ;;  %v1676_v1 = vld [vmem:[%s2457_s9] ss:$0 sm:$0xff] }
 0x5aa   : > { %v1802_v3 = vpop.f32.mrb[23].mxu0  ;;  %1824 = vmatmul.mubr.msk.bf16.vlgmr.msra.gmra.mrb[28].mxu0 %vm774_vm4, %v1225_v63 }
 0x5ab   : > { %v1217_v4 = vpop.f32.mrb[20].mxu1  ;;  %1837 = vmatprep.mubr.msk.bf16.mxu0 %vm1986_vm1, %v1985_v10 }
 0x5ac   : > { %v1226_v5 = vpack.c.bf16 %v1217_v4, %v1217_v4  ;;  %v1807_v56 = vpop.f32.mrb[21].mxu1 }
 0x5ad   : > { %v1220_v62 = vpop.f32.mrb[22].mxu1  ;;  %v531_v56 = vld [vmem:[%s2460_s12 + $0x28] sm:$0xff] }
 0x5ae   : > { %v1808_v6 = vpop.f32.mrb[23].mxu1  ;;  %1830 = vmatmul.mubr.msk.bf16.vlgmr.msra.gmra.mrb[28].mxu1 %vm774_vm4, %v1226_v5  ;;  %v530_v5 = vld [vmem:[%s2460_s12 + $0x20] sm:$0xff] }
 0x5af   : > { %1849 = vmatprep.mubr.msk.bf16.mxu1 %vm1986_vm1, %v1985_v10  ;;  %1842 = vmatpush3.bf16.msra.mxu1 %v534_v48  ;;  %v536_v62 = vpack.c.bf16 %v531_v56, %v530_v5  ;;  %v532_v6 = vld [vmem:[%s2460_s12 + $0x30] sm:$0xff] }
 0x5b0   : > { %1843 = vmatprep.subr.bf16.mxu1 %v1985_v10 }
 0x5b3   : > { %1844 = vmatpush3.bf16.msra.mxu1 %v535_v50 }
 0x5b4   : > { %1845 = vmatprep.subr.bf16.mxu1 %v1985_v10 }
 0x5b7   : > { %1846 = vmatpush3.bf16.msra.mxu1 %v536_v62 }
 0x5b8   : > { %1847 = vmatprep.subr.bf16.mxu1 %v1985_v10 }
 0x675   : > { %v1267_v7 = vpop.f32.mrb[24].mxu0 }
 0x676   : > { %v1813_v11 = vpop.f32.mrb[25].mxu0  ;;  %v1411_v15 = vsel %vm542_vm0, %v1267_v7, 0.0  ;;  %v533_v7 = vld [vmem:[%s2460_s12 + $0x38] sm:$0xff] }
 0x677   : > { %v1270_v12 = vpop.f32.mrb[26].mxu0  ;;  %v537_v11 = vpack.c.bf16 %v533_v7, %v532_v6 }
 0x678   : > { %v1814_v13 = vpop.f32.mrb[27].mxu0  ;;  %v1677_v12 = vld [vmem:[%s2459_s11] ss:$0 sm:$0xff] }
 0x679   : > { %v1313_v14 = vpop.f32.mrb[24].mxu1  ;;  %1848 = vmatpush3.bf16.msra.mxu1 %v537_v11 }
 0x67a   : > { %v1412_v16 = vsel %vm542_vm0, %v1313_v14, 0.0  ;;  %v1819_v17 = vpop.f32.mrb[25].mxu1 }
 0x67b   : > { %v1413_v18 = vadd.f32 %v1412_v16, %v1411_v15  ;;  %v1316_v19 = vpop.f32.mrb[26].mxu1 }
 0x67c   : > { %v1820_v20 = vpop.f32.mrb[27].mxu1  ;;  %v1679_v19 = vld [vmem:[%s2461_s13] ss:$0 sm:$0xff] }
 0x67d   : > { %v1359_v21 = vpop.f32.mrb[28].mxu0 }
 0x67e   : > { %v1414_v22 = vsel %vm542_vm0, %v1359_v21, 0.0  ;;  %v1825_v23 = vpop.f32.mrb[29].mxu0 }
 0x67f   : > { %v1415_v24 = vadd.f32 %v1414_v22, %v1413_v18  ;;  %v1362_v25 = vpop.f32.mrb[30].mxu0 }
 0x680   : > { %v1826_v26 = vpop.f32.mrb[31].mxu0 }
 0x681   : > { %v1405_v27 = vpop.f32.mrb[28].mxu1 }
 0x682   : > { %v1416_v8 = vsel %vm542_vm0, %v1405_v27, 0.0  ;;  %v1831_v9 = vpop.f32.mrb[29].mxu1 }
 0x683   : > { %v1417_v29 = vadd.f32 %v1416_v8, %v1415_v24  ;;  %v1408_v30 = vpop.f32.mrb[30].mxu1 }
 0x684   : > { %v1832_v31 = vpop.f32.mrb[31].mxu1 }
 0x685   : > { %v1424_v32 = vadd.f32 %v1674_v28, %v1417_v29 }
 0x687   : > { %v2340_v33 = vadd.f32 %v1424_v32, %v2122_v0  ;;  %v520_v0 = vld [vmem:[%s2458_s10 + $0x8] sm:$0xff] }
 0x688   : > { %v523_v42 = vpack.c.bf16 %v520_v0, %v519_v40 }
 0x689   : > { %v1426_v34 = vsel %vm542_vm0, %v2340_v33, 0.0 }
 0x68a   : > { %1427 = vadd.xlane.f32.xlu1 %v1426_v34  ;;  %1834 = vmatpush3.bf16.msra.mxu0 %v523_v42 }
 0x68b   : > { %1835 = vmatprep.subr.bf16.mxu0 %v1985_v10 }
 0x68e   : > { %1836 = vmatpush3.bf16.msra.mxu0 %v524_v44 }
 0x717   : > { %v1428_v35 = vpop.xlane.xlu1 %1427 }
 0x718   : > { %v1429_v36 = vmul.f32 0.03125, %v1428_v35 }
 0x71a   : > { %v1430_v37 = vsub.f32 %v2340_v33, %v1429_v36 }
 0x71c   : > { %v1431_v38 = vmul.f32 %v1430_v37, %v1430_v37  ;;  %v1442_v61 = vmul.f32 %v1675_v60, %v1430_v37 }
 0x71e   : > { %v1432_v39 = vsel %vm542_vm0, %v1431_v38, 0.0 }
 0x71f   : > { %1433 = vadd.xlane.f32.xlu0 %v1432_v39 }
 0x7ac   : > { %v1434_v51 = vpop.xlane.xlu0 %1433 }
 0x7ad   : > { %v1435_v52 = vmul.f32 0.032258064, %v1434_v51 }
 0x7af   : > { %1917 = vrsqrt.f32 %v1435_v52  ;;  %vm1445_vm8 = vcmp.eq.f32.partialorder %v1435_v52, inf  ;;  %v1448_v55 = vand.u32 2147483648, %v1435_v52  ;;  %vm1447_vm9 = vcmp.eq.f32.partialorder %v1435_v52, 0.0 }
 0x7b9   : > { %v1918_v53 = vpop.eup %1917 }
 0x7ba   : > { %v1444_v54 = vmul.f32 %v1918_v53, %v1435_v52 }
 0x7bc   : > { %v1446_v57 = vsel %vm1445_vm8, %v1435_v52, %v1444_v54 }
 0x7bd   : > { %v1449_v58 = vsel %vm1447_vm9, %v1448_v55, %v1446_v57 }
 0x7be   : > { %v1450_v59 = vadd.f32 1e-06, %v1449_v58 }
 0x7c0   : > { %1919 = vrcp.f32 %v1450_v59 }
 0x7ca   : > { %v1920_v63 = vpop.eup %1919 }
 0x7cb   : > { %v1452_v2 = vmul.f32 %v1920_v63, %v1442_v61 }
 0x7cd   : > { %v1459_v3 = vadd.f32 %v1676_v1, %v1452_v2 }
 0x7cf   : > { %v1460_v4 = vpack.c.bf16 %v1459_v3, %v1459_v3 }
 0x7d1   : > { %1838 = vmatmul.mubr.msk.bf16.vlgmr.msra.gmra.mrb[32].mxu0 %vm542_vm0, %v1460_v4 }
 0x8a4   : > { %v1504_v13 = vpop.f32.mrb[32].mxu0 }
 0x8a5   : > { %v1505_v14 = vadd.f32 %v1677_v12, %v1504_v13  ;;  %v1839_v15 = vpop.f32.mrb[33].mxu0 }
 0x8a6   : > { %v1507_v16 = vpop.f32.mrb[34].mxu0 }
 0x8a7   : > { %v1510_v10 = vmax.f32 %v1505_v14, 0.0  ;;  %v1840_v17 = vpop.f32.mrb[35].mxu0 }
 0x8a9   : > { %v1511_v18 = vpack.c.bf16 %v1510_v10, %v1510_v10 }
 0x8ab   : > { %1850 = vmatmul.mubr.msk.bf16.vlgmr.msra.gmra.mrb[32].mxu1 %vm1518_vm10, %v1511_v18 }
 0x97e   : > { %v1556_v20 = vpop.f32.mrb[32].mxu1 }
 0x97f   : > { %v1557_v21 = vadd.f32 %v1679_v19, %v1556_v20  ;;  %v1851_v22 = vpop.f32.mrb[33].mxu1 }
 0x980   : > { %v1559_v23 = vpop.f32.mrb[34].mxu1 }
 0x981   : > { %v1562_v24 = vadd.f32 %v1557_v21, %v2340_v33  ;;  %v1852_v25 = vpop.f32.mrb[35].mxu1 }
 0x983   : > { %1563 = vst.msk [vmem:[%s469_s22] sm:$0xff] %vm542_vm0, %v1562_v24 }
 0x984   : > { %1934 = shalt.err (!%p1931_p3)
}
 0x985   : > { %s1935_s18 = scalar_lea.hbm %s2405_s26, 128  ;;  %s1939_s21 = scalar_lea.hbm %s2462_s14, 256 }
 0x986   : > { %p1936_p4 = scmp.ne.s32.totalorder %s2405_s26, %s1935_s18  ;;  %p1940_p9 = scmp.lt.u32.totalorder %s2405_s26, %s2462_s14 }
 0x987   : > { %p1941_p10 = scmp.lt.u32.totalorder %s1939_s21, %s1935_s18  ;;  %p1943_p12 = scmp.lt.u32.totalorder %s1935_s18, %s2405_s26 }
 0x988   : > { %p1937_p7 = pnand %p1936_p4, %p2104_p5 }
 0x989   : > { %p1942_p11 = por %p1941_p10, %p1940_p9 }
 0x98a   : > { %p1938_p8 = pneg %p1937_p7 }
 0x98b   : > { %p1944_p13 = por %p1943_p12, %p1942_p11 }
 0x98d   : > { %p1945_p0 = pnand %p1944_p13, %p1938_p8 }
 0x98f   : > { %1948 = shalt.err (!%p1945_p0)
}
 0x990   : > { %1853 = dma.vmem_to_hbm [thread:$0]  (%p2104_p5), %s2407_s20, 128, %s2405_s26, %s1565_s17  }
 0x991 PF: > { %p1859_p1 = scmp.ge.s32.totalorder %s1983_s16, 2  ;;  %s1590_s28 = sand.u32 1, %s1971_s29  }
 0x992   : > { %s1591_s15 = scalar_lea.sflag [#allocation3], %s1590_s28 }
 0x993   : > { %p1856_p2 = pnand %p1859_p1, %p2108_p6 }
 0x995   : > { %1966 = dma.done.wait (!%p1856_p2), %s1591_s15, 128  }
 0x996   : > { %1968 = vsyncadd (!%p1856_p2), %s1591_s15, 4294967168  ;;  %s2473_s16 = sld [smem:[#allocation6_spill]]  ;;  %s2474_s25 = sld [smem:[#allocation5_spill]] }
 0x997   : > { %s2475_s15 = sld [smem:[#allocation7_spill]]  ;;  %s2476_s29 = smov %s1975_s30 }
 0x99c   : > { %p24_p3 = scmp.ge.s32.totalorder %s2473_s16, 4   ;;  %s2477_s30 = smov %s2474_s25 }
 0x99e   :  { %26 = sbr.rel (!%p24_p3) target bundleno = 5 (0x5), region = 114 }
 0x9a5   :  { %1596 = vsyncpa [#allocation3], 1 }
 0x9a6   :  { %1598 = vsyncpa [#allocation3 + $0x1], 1 }

</bundles_post_ra>
